<compile_context>
chip_gen: v7x
topology: tpu7x:2x2x1
jax: 0.10.0
libtpu: 0.0.40
codegen_flags: <defaults>
</compile_context>

<pallas_src>
import jax
import jax.numpy as jnp
from jax.experimental import pallas as pl
from jax.experimental.pallas import tpu as pltpu


_DEFAULT_TILE_BYTES = 4 << 20    # ~4 MiB per operand per grid step
_VMEM_LIMIT_BYTES = 48 << 20     # 4 ops x 2 bufs x 4 MiB = 32 MiB + headroom;
                                 # <= v7x 64 MiB physical, << v5e/v6e 128 MiB


def _linear_fuse_kernel(ratio_ref, x0_ref, x1_ref, o0_ref, o1_ref):
    """Elementwise blend on the VPU; f32 math, single cast on each store."""
    r = ratio_ref[0]                          # f32 scalar from SMEM
    a = x0_ref[...].astype(jnp.float32)
    b = x1_ref[...].astype(jnp.float32)
    d = r * (a - b)                           # o0 = b + r*(a-b); o1 = a - r*(a-b)
    o0_ref[...] = (b + d).astype(o0_ref.dtype)
    o1_ref[...] = (a - d).astype(o1_ref.dtype)


def _choose_layout(n_elems, itemsize, target_tile_bytes):
    """Pick (rows, lane, tile_rows) for a lane-dense slab + ~target-sized tiles."""
    pack = max(8, 32 // itemsize)             # sublanes per vreg for this dtype
    lane = 128                                # safe fallback (block == full array)
    for cand in (4096, 2048, 1024, 512, 256, 128):
        if n_elems % cand == 0 and (n_elems // cand) >= pack:
            lane = cand
            break
    rows = n_elems // lane

    target_rows = (target_tile_bytes // (lane * itemsize)) // pack * pack
    target_rows = max(pack, target_rows)
    if rows <= target_rows:
        return rows, lane, rows               # single full-extent block

    # Prefer a divisor of rows (multiple of pack): no masked partial last block.
    tile_rows = target_rows
    for cand_rows in range(target_rows, pack - 1, -pack):
        if rows % cand_rows == 0:
            tile_rows = cand_rows
            break
    return rows, lane, tile_rows


def _dimension_semantics():
    """CORE_PARALLEL on v7x (2 TensorCores/chip); plain 'parallel' elsewhere."""
    try:
        kind = jax.devices()[0].device_kind.lower()
    except Exception:
        return ("parallel",)
    if "7" in kind and hasattr(pltpu, "CORE_PARALLEL"):
        return (pltpu.CORE_PARALLEL,)
    return ("parallel",)


def _build_call(rows, lane, tile_rows, dtype, dims):
    grid = (pl.cdiv(rows, tile_rows),)
    spec = pl.BlockSpec((tile_rows, lane), lambda i, ratio_ref: (i, 0))
    return pl.pallas_call(
        _linear_fuse_kernel,
        out_shape=(
            jax.ShapeDtypeStruct((rows, lane), dtype),
            jax.ShapeDtypeStruct((rows, lane), dtype),
        ),
        grid_spec=pltpu.PrefetchScalarGridSpec(
            num_scalar_prefetch=1,            # ratio -> SMEM, no retrace per value
            grid=grid,
            in_specs=[spec, spec],
            out_specs=[spec, spec],
        ),
        compiler_params=pltpu.CompilerParams(
            dimension_semantics=dims,
            vmem_limit_bytes=_VMEM_LIMIT_BYTES,
        ),
    )


def linear_fuse(x0, x1, ratio, target_tile_bytes=_DEFAULT_TILE_BYTES):
    """Pallas implementation of LinearFuse.forward([x0, x1])."""
    assert x0.shape == x1.shape and x0.dtype == x1.dtype
    orig_shape = x0.shape
    n_elems = x0.size
    # TODO(synk): backbone feature maps always satisfy this; a general
    # fallback would pad a flat 1D copy to a multiple of 128.
    assert n_elems % 128 == 0, "total elements must be a multiple of 128"

    rows, lane, tile_rows = _choose_layout(
        n_elems, x0.dtype.itemsize, target_tile_bytes)

    # Contiguous reshape to a lane-dense 2D slab (no HBM relayout).
    x0_2d = x0.reshape(rows, lane)
    x1_2d = x1.reshape(rows, lane)
    ratio_arr = jnp.asarray([ratio], dtype=jnp.float32)

    dims = _dimension_semantics()
    try:
        o0_2d, o1_2d = _build_call(rows, lane, tile_rows, x0.dtype, dims)(
            ratio_arr, x0_2d, x1_2d)
    except Exception:
        if dims == ("parallel",):
            raise
        # Conservative fallback if CORE_PARALLEL is rejected on this chip.
        o0_2d, o1_2d = _build_call(rows, lane, tile_rows, x0.dtype,
                                   ("parallel",))(ratio_arr, x0_2d, x1_2d)

    return [o0_2d.reshape(orig_shape), o1_2d.reshape(orig_shape)]


def _check(x0, x1, ratio, atol, **kwargs):
    out = linear_fuse(x0, x1, ratio, **kwargs)
    jax.block_until_ready(out)
    a = x0.astype(jnp.float32)
    b = x1.astype(jnp.float32)
    ref0 = ratio * a + (1.0 - ratio) * b
    ref1 = (1.0 - ratio) * a + ratio * b
    assert jnp.allclose(out[0].astype(jnp.float32), ref0, atol=atol), "x0 blend mismatch"
    assert jnp.allclose(out[1].astype(jnp.float32), ref1, atol=atol), "x1 blend mismatch"


if __name__ == "__main__":
    key = jax.random.PRNGKey(0)
    k0, k1, k2, k3, k4, k5 = jax.random.split(key, 6)

    # Small NCHW feature maps (module forward takes a list/tuple of 2).
    shape_small = (2, 4, 16, 16)                 # rows>=pack lane choice path
    x0 = jax.random.normal(k0, shape_small, dtype=jnp.float32)
    x1 = jax.random.normal(k1, shape_small, dtype=jnp.float32)
    _check(x0, x1, 0.7, atol=1e-5)

    # Larger map: default 4 MiB tiles -> single full-extent block.
    shape_mid = (2, 64, 56, 56)
    y0 = jax.random.normal(k2, shape_mid, dtype=jnp.float32)
    y1 = jax.random.normal(k3, shape_mid, dtype=jnp.float32)
    _check(y0, y1, 0.25, atol=1e-5)

    # Same data, tiny tile budget -> multi-step grid with masked partial block.
    _check(y0, y1, 0.25, atol=1e-5, target_tile_bytes=1 << 16)

    # bf16 path: sublane packing of 16 for tile/lane choice, f32 math inside.
    shape_bf16 = (2, 32, 32, 32)
    z0 = jax.random.normal(k4, shape_bf16, dtype=jnp.bfloat16)
    z1 = jax.random.normal(k5, shape_bf16, dtype=jnp.bfloat16)
    _check(z0, z1, 0.6, atol=2e-2)

    print("KERNEL_OK")
</pallas_src>

<mosaic_0001>
module attributes {stable_mosaic.version = 11 : i64} {
  func.func @_linear_fuse_kernel(%arg0: i32, %arg1: memref<1xf32, #tpu.memory_space<smem>>, %arg2: memref<8x256xf32, #tpu.memory_space<vmem>>, %arg3: memref<8x256xf32, #tpu.memory_space<vmem>>, %arg4: memref<8x256xf32, #tpu.memory_space<vmem>>, %arg5: memref<8x256xf32, #tpu.memory_space<vmem>>) attributes {dimension_semantics = [#tpu.dimension_semantics<parallel>], iteration_bounds = array<i64: 1>, scalar_prefetch = 1 : i64, scratch_operands = 0 : i64, tpu.core_type = #tpu.core_type<tc>, window_params = [{transform_indices = @transform_0, window_bounds = array<i64: 8, 256>}, {transform_indices = @transform_1, window_bounds = array<i64: 8, 256>}, {transform_indices = @transform_2, window_bounds = array<i64: 8, 256>}, {transform_indices = @transform_3, window_bounds = array<i64: 8, 256>}]} {
    %c0 = arith.constant 0 : index
    %0 = memref.load %arg1[%c0] : memref<1xf32, #tpu.memory_space<smem>>
    %c0_0 = arith.constant 0 : index
    %c0_1 = arith.constant 0 : index
    %1 = vector.load %arg2[%c0_0, %c0_1] : memref<8x256xf32, #tpu.memory_space<vmem>>, vector<8x256xf32>
    %c0_2 = arith.constant 0 : index
    %c0_3 = arith.constant 0 : index
    %2 = vector.load %arg3[%c0_2, %c0_3] : memref<8x256xf32, #tpu.memory_space<vmem>>, vector<8x256xf32>
    %3 = arith.subf %1, %2 : vector<8x256xf32>
    %4 = vector.broadcast %0 : f32 to vector<8x256xf32>
    %5 = arith.mulf %4, %3 : vector<8x256xf32>
    %6 = arith.addf %2, %5 : vector<8x256xf32>
    %c0_4 = arith.constant 0 : index
    %c0_5 = arith.constant 0 : index
    %7 = vector.load %arg4[%c0_4, %c0_5] : memref<8x256xf32, #tpu.memory_space<vmem>>, vector<8x256xf32>
    tpu.vector_store %arg4[%c0_4, %c0_5], %6 {strides = array<i32>} : memref<8x256xf32, #tpu.memory_space<vmem>>, vector<8x256xf32>,
    %8 = arith.subf %1, %5 : vector<8x256xf32>
    %c0_6 = arith.constant 0 : index
    %c0_7 = arith.constant 0 : index
    %9 = vector.load %arg5[%c0_6, %c0_7] : memref<8x256xf32, #tpu.memory_space<vmem>>, vector<8x256xf32>
    tpu.vector_store %arg5[%c0_6, %c0_7], %8 {strides = array<i32>} : memref<8x256xf32, #tpu.memory_space<vmem>>, vector<8x256xf32>,
    return
  }
  func.func @transform_0(%arg0: i32, %arg1: memref<1xf32, #tpu.memory_space<smem>>) -> (i32, i32) {
    %c0_i32 = arith.constant 0 : i32
    %c0_i32_0 = arith.constant 0 : i32
    return %arg0, %c0_i32 : i32, i32
  }
  func.func @transform_1(%arg0: i32, %arg1: memref<1xf32, #tpu.memory_space<smem>>) -> (i32, i32) {
    %c0_i32 = arith.constant 0 : i32
    %c0_i32_0 = arith.constant 0 : i32
    return %arg0, %c0_i32 : i32, i32
  }
  func.func @transform_2(%arg0: i32, %arg1: memref<1xf32, #tpu.memory_space<smem>>) -> (i32, i32) {
    %c0_i32 = arith.constant 0 : i32
    %c0_i32_0 = arith.constant 0 : i32
    return %arg0, %c0_i32 : i32, i32
  }
  func.func @transform_3(%arg0: i32, %arg1: memref<1xf32, #tpu.memory_space<smem>>) -> (i32, i32) {
    %c0_i32 = arith.constant 0 : i32
    %c0_i32_0 = arith.constant 0 : i32
    return %arg0, %c0_i32 : i32, i32
  }
}

</mosaic_0001>

<bundles_post_ra>
// kernel: tpu_custom_call.1
= control target key start
LH: loop header
LB: loop body
LE: loop exit
PB: predicated region body
PF: predicated region fallthrough
CT: control target
= control target key end

     0   :  { %11 = vsyncpa [#allocation5], 0  ;;  %s269_s0 = inlined_call_operand.<no memory space> [shape: f32[1], index: 0, kind: input, shape index: {}]   ;;  %s270_s1 = inlined_call_operand.hbm [shape: f32[8,256], index: 1, kind: input, shape index: {}]   ;;  %s271_s2 = inlined_call_operand.hbm [shape: f32[8,256], index: 2, kind: input, shape index: {}]   ;;  %s272_s3 = inlined_call_operand.hbm [shape: f32[8,256], index: 3, kind: output, shape index: {0}]   ;;  %s273_s4 = inlined_call_operand.hbm [shape: f32[8,256], index: 4, kind: output, shape index: {1}]  }
   0x1   :  { %12 = vsyncpa [#allocation8], 0 }
   0x2   :  { %13 = vsyncpa [#allocation6], 0 }
   0x3   :  { %14 = vsyncpa [#allocation11], 0  ;;  %s189_s15 = smov [#allocation4]   ;;  %s190_s17 = smov [#allocation7]  }
   0x4   :  { %s21_s16 = sshll.u32 %s189_s15, 4  ;;  %s31_s18 = sshll.u32 %s190_s17, 4  ;;  %s22_s16 = int_to_ptr.vmem [resolvable:$true] %s21_s16  ;;  %s32_s18 = int_to_ptr.vmem [resolvable:$true] %s31_s18 }
   0x5   :  { %s93_s21 = scalar_lea.hbm %s270_s1, 256 }
   0x6   :  { %p94_p0 = scmp.ne.s32.totalorder %s270_s1, %s93_s21  ;;  %p97_p1 = scmp.lt.u32.totalorder %s93_s21, %s270_s1 }
   0x8   :  { %p99_p2 = pnand %p97_p1, %p94_p0 }
   0xa   :  { %102 = shalt.err (!%p99_p2)
}
   0xb   :  { %s103_s26 = scalar_lea.vmem %s22_s16, 256  ;;  %p108_p4 = scmp.lt.s32.totalorder %s22_s16, %s22_s16 }
   0xc   :  { %p104_p3 = scmp.ne.s32.totalorder %s22_s16, %s103_s26  ;;  %p109_p5 = scmp.lt.s32.totalorder %s103_s26, %s103_s26 }
   0xe   :  { %p110_p6 = por %p109_p5, %p108_p4 }
  0x10   :  { %p111_p7 = pnand %p110_p6, %p104_p3 }
  0x12   :  { %114 = shalt.err (!%p111_p7)
}
  0x13   :  { %24 = dma.hbm_to_vmem [thread:$0]  %s270_s1, 256, %s22_s16, [#allocation5]  }
  0x14   :  { %s115_s5 = scalar_lea.hbm %s271_s2, 256 }
  0x15   :  { %p116_p8 = scmp.ne.s32.totalorder %s271_s2, %s115_s5  ;;  %p119_p9 = scmp.lt.u32.totalorder %s115_s5, %s271_s2 }
  0x17   :  { %p121_p10 = pnand %p119_p9, %p116_p8 }
  0x19   :  { %124 = shalt.err (!%p121_p10)
}
  0x1a   :  { %s125_s10 = scalar_lea.vmem %s32_s18, 256  ;;  %p130_p12 = scmp.lt.s32.totalorder %s32_s18, %s32_s18 }
  0x1b   :  { %p126_p11 = scmp.ne.s32.totalorder %s32_s18, %s125_s10  ;;  %p131_p13 = scmp.lt.s32.totalorder %s125_s10, %s125_s10 }
  0x1d   :  { %p132_p0 = por %p131_p13, %p130_p12 }
  0x1f   :  { %p133_p1 = pnand %p132_p0, %p126_p11 }
  0x21   :  { %136 = shalt.err (!%p133_p1)
}
  0x22   :  { %34 = dma.hbm_to_vmem [thread:$0]  %s271_s2, 256, %s32_s18, [#allocation8]  }
  0x23   :  { %181 = dma.done.wait [#allocation5], 256  }
  0x24   :  { %182 = vsyncadd [#allocation5], 4294967040 }
  0x25   :  { %183 = dma.done.wait [#allocation8], 256  }
  0x26   :  { %184 = vsyncadd [#allocation8], 4294967040  ;;  %v42_v0 = vld [vmem:[#allocation4] sm:$0xff]  ;;  %v44_v1 = vld [vmem:[#allocation7] sm:$0xff]  ;;  %v48_v2 = vstv %s269_s0  ;;  %s191_s14 = smov [#allocation9]   ;;  %s192_s16 = smov [#allocation10]  }
  0x27   :  { %v43_v3 = vld [vmem:[#allocation4 + $0x8] sm:$0xff]  ;;  %v46_v4 = vsub.f32 %v42_v0, %v44_v1  ;;  %v45_v5 = vld [vmem:[#allocation7 + $0x8] sm:$0xff]  ;;  %s65_s15 = sshll.u32 %s191_s14, 4  ;;  %s75_s2 = sshll.u32 %s192_s16, 4  ;;  %s66_s15 = int_to_ptr.vmem [resolvable:$true] %s65_s15  ;;  %s76_s2 = int_to_ptr.vmem [resolvable:$true] %s75_s2 }
  0x28   :  { %v47_v6 = vsub.f32 %v43_v3, %v45_v5  ;;  %s137_s0 = scalar_lea.vmem %s66_s15, 256  ;;  %p142_p3 = scmp.lt.s32.totalorder %s66_s15, %s66_s15 }
  0x29   :  { %v49_v7 = vmul.f32 %v48_v2, %v46_v4  ;;  %p138_p2 = scmp.ne.s32.totalorder %s66_s15, %s137_s0  ;;  %p143_p4 = scmp.lt.s32.totalorder %s137_s0, %s137_s0 }
  0x2a   :  { %v50_v8 = vmul.f32 %v48_v2, %v47_v6 }
  0x2b   :  { %v51_v9 = vadd.f32 %v49_v7, %v44_v1  ;;  %v55_v10 = vsub.f32 %v42_v0, %v49_v7  ;;  %p144_p5 = por %p143_p4, %p142_p3 }
  0x2c   :  { %v52_v11 = vadd.f32 %v50_v8, %v45_v5  ;;  %v56_v12 = vsub.f32 %v43_v3, %v50_v8 }
  0x2d   :  { %53 = vst [vmem:[#allocation9] sm:$0xff] %v51_v9  ;;  %57 = vst [vmem:[#allocation10] sm:$0xff] %v55_v10  ;;  %p145_p6 = pnand %p144_p5, %p138_p2 }
  0x2e   :  { %54 = vst [vmem:[#allocation9 + $0x8] sm:$0xff] %v52_v11  ;;  %58 = vst [vmem:[#allocation10 + $0x8] sm:$0xff] %v56_v12 }
  0x2f   :  { %148 = shalt.err (!%p145_p6)
}
  0x30   :  { %s149_s19 = scalar_lea.hbm %s272_s3, 256 }
  0x31   :  { %p150_p7 = scmp.ne.s32.totalorder %s272_s3, %s149_s19  ;;  %p153_p8 = scmp.lt.u32.totalorder %s149_s19, %s272_s3 }
  0x33   :  { %p155_p9 = pnand %p153_p8, %p150_p7 }
  0x35   :  { %158 = shalt.err (!%p155_p9)
}
  0x36   :  { %68 = dma.vmem_to_hbm [thread:$0]  %s66_s15, 256, %s272_s3, [#allocation6]  }
  0x37   :  { %s159_s26 = scalar_lea.vmem %s76_s2, 256  ;;  %p164_p11 = scmp.lt.s32.totalorder %s76_s2, %s76_s2 }
  0x38   :  { %p160_p10 = scmp.ne.s32.totalorder %s76_s2, %s159_s26  ;;  %p165_p12 = scmp.lt.s32.totalorder %s159_s26, %s159_s26 }
  0x3a   :  { %p166_p13 = por %p165_p12, %p164_p11 }
  0x3c   :  { %p167_p0 = pnand %p166_p13, %p160_p10 }
  0x3e   :  { %170 = shalt.err (!%p167_p0)
}
  0x3f   :  { %s171_s29 = scalar_lea.hbm %s273_s4, 256 }
  0x40   :  { %p172_p1 = scmp.ne.s32.totalorder %s273_s4, %s171_s29  ;;  %p175_p2 = scmp.lt.u32.totalorder %s171_s29, %s273_s4 }
  0x42   :  { %p177_p3 = pnand %p175_p2, %p172_p1 }
  0x44   :  { %180 = shalt.err (!%p177_p3)
}
  0x45   :  { %78 = dma.vmem_to_hbm [thread:$0]  %s76_s2, 256, %s273_s4, [#allocation11]  }
  0x46   :  { %185 = dma.done.wait [#allocation6], 256  }
  0x47   :  { %186 = vsyncadd [#allocation6], 4294967040 }
  0x48   :  { %187 = dma.done.wait [#allocation11], 256  }
  0x49   :  { %188 = vsyncadd [#allocation11], 4294967040 }
  0x4a   :  { %85 = vsyncpa [#allocation5], 1 }
  0x4b   :  { %86 = vsyncpa [#allocation8], 1 }
  0x4c   :  { %87 = vsyncpa [#allocation6], 1 }
  0x4d   :  { %88 = vsyncpa [#allocation11], 1 }

</bundles_post_ra>
